<compile_context>
chip_gen: v6e
topology: v6e:2x2x1
jax: 0.10.0
libtpu: 0.0.40
codegen_flags: <defaults>
</compile_context>

<pallas_src>
import itertools
import numpy as np
import jax
import jax.numpy as jnp
from jax.experimental import pallas as pl
from jax.experimental.pallas import tpu as pltpu

EPS = 1e-5
NEG_SLOPE = 0.1
LANE = 128
VMEM_LIMIT = 32 * 1024 * 1024


def _round_up(v, m):
    return (v + m - 1) // m * m


def _leaky_f32(y):
    return jnp.where(y >= 0, y, NEG_SLOPE * y)


# ---------------------------------------------------------------------------
# Kernel 1: tiled BatchNorm statistics -> fused affine (scale, shift)
#   scale = gamma * rsqrt(var + eps),   shift = beta - mean * scale
# Accumulates per-channel sum / sum-of-squares into the resident (2, C) output block
# across a row grid.  Tail masking is only emitted when the grid is statically ragged
# (the zero pad ring of the slab contributes nothing to the sums).
# ---------------------------------------------------------------------------
def bn_stats_scale_shift(x, gamma, beta, count, bm=1024):
    M, C = x.shape
    bm = min(bm, M)
    nsteps = pl.cdiv(M, bm)
    ragged = (M % bm) != 0
    inv_count = 1.0 / float(count)

    def kernel(x_ref, g_ref, b_ref, o_ref):
        i = pl.program_id(0)

        @pl.when(i == 0)
        def _():
            o_ref[...] = jnp.zeros_like(o_ref)

        x_blk = x_ref[...].astype(jnp.float32)
        if ragged:  # static: only emit the iota mask when the last block is partial
            row = jax.lax.broadcasted_iota(jnp.int32, (bm, 1), 0) + i * bm
            x_blk = jnp.where(row < M, x_blk, 0.0)
        o_ref[0:1, :] += jnp.sum(x_blk, axis=0, keepdims=True)
        o_ref[1:2, :] += jnp.sum(x_blk * x_blk, axis=0, keepdims=True)

        @pl.when(i == nsteps - 1)
        def _():
            # NOTE: E[x^2] - E[x]^2 in f32; fine for normalized-scale activations.
            mean = o_ref[0:1, :] * inv_count
            var = o_ref[1:2, :] * inv_count - mean * mean
            scale = g_ref[...] * jax.lax.rsqrt(var + EPS)
            o_ref[0:1, :] = scale
            o_ref[1:2, :] = b_ref[...] - mean * scale

    return pl.pallas_call(
        kernel,
        out_shape=jax.ShapeDtypeStruct((2, C), jnp.float32),
        grid=(nsteps,),
        in_specs=[pl.BlockSpec((bm, C), lambda i: (i, 0)),
                  pl.BlockSpec((1, C), lambda i: (0, 0)),
                  pl.BlockSpec((1, C), lambda i: (0, 0))],
        out_specs=pl.BlockSpec((2, C), lambda i: (0, 0)),
        compiler_params=pltpu.CompilerParams(dimension_semantics=("arbitrary",)),
    )(x, gamma, beta)


# ---------------------------------------------------------------------------
# Kernel 2: fused  BN1-apply + LeakyReLU + mask  ->  3x3 conv1  ->  BN2 statistics.
# The normalization is hoisted into a single VMEM scratch slab; the 3x3/pad=1/stride=1
# conv is 9 row-shifted MXU matmuls off that scratch.  Outputs (per image, ring-free):
#   r1      : masked conv1 result, bf16
#   stats   : rows 0/1 of an (8, Cout) block hold per-image sum / sum_sq of r1 (f32)
#   act1    : (optional) the normalized input interior, bf16 — the pre_res_act shortcut
# ---------------------------------------------------------------------------
def conv1_bn_fused(x_slab, w_flat, scale_shift, mask_img, N, H, Wp, emit_act1):
    rows_img = (H + 4) * Wp
    rows_out = H * Wp
    base = 2 * Wp
    Cin = x_slab.shape[1]
    Cout = w_flat.shape[1]

    def kernel(*refs):
        if emit_act1:
            (x_ref, w_ref, sb_ref, m_ref,
             r_ref, st_ref, a1_ref, nrm_ref, acc_ref) = refs
        else:
            (x_ref, w_ref, sb_ref, m_ref,
             r_ref, st_ref, nrm_ref, acc_ref) = refs

        # BN1 affine + LeakyReLU + zero-pad mask, applied ONCE per element.
        y = x_ref[...].astype(jnp.float32) * sb_ref[0:1, :] + sb_ref[1:2, :]
        nrm_ref[...] = _leaky_f32(y) * m_ref[...]

        # 3x3 conv = 9 row-shifted MXU matmuls from the normalized scratch.
        for t, (kh, kw) in enumerate(itertools.product(range(3), range(3))):
            off = base + (kh - 1) * Wp + (kw - 1)
            contrib = jnp.dot(nrm_ref[off:off + rows_out, :].astype(jnp.bfloat16),
                              w_ref[t * Cin:(t + 1) * Cin, :],
                              preferred_element_type=jnp.float32)
            if t == 0:
                acc_ref[...] = contrib
            else:
                acc_ref[...] += contrib

        interior = acc_ref[...] * m_ref[base:base + rows_out, :]   # zero garbage cols
        r_ref[...] = interior.astype(r_ref.dtype)

        # BN2 statistics fused into the epilogue (f32, from the accumulator).
        st_ref[0:1, :] = jnp.sum(interior, axis=0, keepdims=True)
        st_ref[1:2, :] = jnp.sum(interior * interior, axis=0, keepdims=True)
        st_ref[2:8, :] = jnp.zeros((6, Cout), jnp.float32)

        if emit_act1:
            a1_ref[...] = nrm_ref[base:base + rows_out, :].astype(a1_ref.dtype)

    out_shapes = [jax.ShapeDtypeStruct((N * rows_out, Cout), jnp.bfloat16),
                  jax.ShapeDtypeStruct((N * 8, Cout), jnp.float32)]
    out_specs = [pl.BlockSpec((rows_out, Cout), lambda n: (n, 0)),
                 pl.BlockSpec((8, Cout), lambda n: (n, 0))]
    if emit_act1:
        out_shapes.append(jax.ShapeDtypeStruct((N * rows_out, Cin), jnp.bfloat16))
        out_specs.append(pl.BlockSpec((rows_out, Cin), lambda n: (n, 0)))

    return pl.pallas_call(
        kernel,
        out_shape=tuple(out_shapes),
        grid=(N,),
        in_specs=[pl.BlockSpec((rows_img, Cin), lambda n: (n, 0)),
                  pl.BlockSpec((9 * Cin, Cout), lambda n: (0, 0)),
                  pl.BlockSpec((2, Cin), lambda n: (0, 0)),
                  pl.BlockSpec((rows_img, 1), lambda n: (0, 0))],
        out_specs=tuple(out_specs),
        scratch_shapes=[pltpu.VMEM((rows_img, Cin), jnp.float32),
                        pltpu.VMEM((rows_out, Cout), jnp.float32)],
        compiler_params=pltpu.CompilerParams(
            dimension_semantics=("parallel",),
            vmem_limit_bytes=VMEM_LIMIT),
    )(x_slab, w_flat, scale_shift, mask_img)


# ---------------------------------------------------------------------------
# Kernel 3: fused  BN2-apply + LeakyReLU + mask  ->  3x3 conv2  ->  shortcut (+1x1
# downsample) + residual add.  r1 arrives ring-free (bf16); the zero padding ring for
# conv2 is rebuilt inside the VMEM scratch, so r1 never carries the ring through HBM.
# ---------------------------------------------------------------------------
def conv2_bn_shortcut(r1, w_flat, scale_shift, mask_int, shortcut, w_down,
                      N, H, Wp, shortcut_has_ring, out_dtype=jnp.float32):
    rows_img = (H + 4) * Wp
    rows_out = H * Wp
    base = 2 * Wp
    C = r1.shape[1]
    Cs = shortcut.shape[1]
    Cout = w_flat.shape[1]
    has_down = w_down is not None
    s_rows = rows_img if shortcut_has_ring else rows_out

    def kernel(*refs):
        if has_down:
            r_ref, w_ref, sb_ref, m_ref, s_ref, wd_ref, o_ref, nrm_ref, acc_ref = refs
        else:
            r_ref, w_ref, sb_ref, m_ref, s_ref, o_ref, nrm_ref, acc_ref = refs

        # BN2 affine + LeakyReLU + column mask, applied ONCE; ring rows rebuilt as zeros
        # so conv2's zero padding is exact.
        y = r_ref[...].astype(jnp.float32) * sb_ref[0:1, :] + sb_ref[1:2, :]
        zero_ring = jnp.zeros((base, C), jnp.float32)
        nrm_ref[0:base, :] = zero_ring
        nrm_ref[base:base + rows_out, :] = _leaky_f32(y) * m_ref[...]
        nrm_ref[base + rows_out:, :] = zero_ring

        for t, (kh, kw) in enumerate(itertools.product(range(3), range(3))):
            off = base + (kh - 1) * Wp + (kw - 1)
            contrib = jnp.dot(nrm_ref[off:off + rows_out, :].astype(jnp.bfloat16),
                              w_ref[t * C:(t + 1) * C, :],
                              preferred_element_type=jnp.float32)
            if t == 0:
                acc_ref[...] = contrib
            else:
                acc_ref[...] += contrib

        sc_raw = s_ref[base:base + rows_out, :] if shortcut_has_ring else s_ref[...]
        if has_down:
            sc = jnp.dot(sc_raw.astype(jnp.bfloat16), wd_ref[...],
                         preferred_element_type=jnp.float32)
        else:
            sc = sc_raw.astype(jnp.float32)
        # NOTE: columns outside [1, W+1) still hold conv garbage; the wrapper drops them.
        o_ref[...] = (acc_ref[...] + sc).astype(o_ref.dtype)

    in_specs = [pl.BlockSpec((rows_out, C), lambda n: (n, 0)),
                pl.BlockSpec((9 * C, Cout), lambda n: (0, 0)),
                pl.BlockSpec((2, C), lambda n: (0, 0)),
                pl.BlockSpec((rows_out, 1), lambda n: (0, 0)),
                pl.BlockSpec((s_rows, Cs), lambda n: (n, 0))]
    args = [r1, w_flat, scale_shift, mask_int, shortcut]
    if has_down:
        in_specs.append(pl.BlockSpec((Cs, Cout), lambda n: (0, 0)))
        args.append(w_down)

    return pl.pallas_call(
        kernel,
        out_shape=jax.ShapeDtypeStruct((N * rows_out, Cout), out_dtype),
        grid=(N,),
        in_specs=in_specs,
        out_specs=pl.BlockSpec((rows_out, Cout), lambda n: (n, 0)),
        scratch_shapes=[pltpu.VMEM((rows_img, C), jnp.float32),
                        pltpu.VMEM((rows_out, Cout), jnp.float32)],
        compiler_params=pltpu.CompilerParams(
            dimension_semantics=("parallel",),
            vmem_limit_bytes=VMEM_LIMIT),
    )(*args)


# ---------------------------------------------------------------------------
# Forward wrapper (accepts NCHW like the PyTorch module; layout plumbing is one fused
# XLA pad/transpose pass at each boundary).
# ---------------------------------------------------------------------------
def basic_block_preact_forward(x_nchw, params, pre_res_act=False):
    N, Cin, H, W = x_nchw.shape
    Cout = params["w1"].shape[-1]
    Cin_p = _round_up(Cin, LANE)
    Cout_p = _round_up(Cout, LANE)

    # Wp is always a multiple of 8 so every (kh-1)*Wp row shift stays sublane aligned.
    Wp = _round_up(W + 2, 8)
    rows_img = (H + 4) * Wp
    rows_out = H * Wp
    base = 2 * Wp
    count = N * H * W

    # ---- layout plumbing: NCHW -> zero-padded NHWC slab (N*(H+4)*Wp, Cin_p) ----
    x = jnp.transpose(x_nchw, (0, 2, 3, 1))
    x = jnp.pad(x, ((0, 0), (2, 2), (1, Wp - W - 1), (0, Cin_p - Cin)))
    x_slab = x.reshape(N * rows_img, Cin_p).astype(jnp.float32)

    # validity masks of the padded spatial plane (identical for every image)
    ii, jj = np.divmod(np.arange(rows_img), Wp)
    valid = (ii >= 2) & (ii < H + 2) & (jj >= 1) & (jj < W + 1)
    mask_img = jnp.asarray(valid.astype(np.float32).reshape(rows_img, 1))
    mask_int = jnp.asarray(valid[base:base + rows_out].astype(np.float32).reshape(rows_out, 1))

    def pad_cb(v, cp):
        v = jnp.asarray(v, jnp.float32).reshape(1, -1)
        return jnp.pad(v, ((0, 0), (0, cp - v.shape[1])))

    g1, b1 = pad_cb(params["gamma1"], Cin_p), pad_cb(params["beta1"], Cin_p)
    g2, b2 = pad_cb(params["gamma2"], Cout_p), pad_cb(params["beta2"], Cout_p)
    w1 = jnp.pad(params["w1"], ((0, 0), (0, 0), (0, Cin_p - Cin), (0, Cout_p - Cout))
                 ).reshape(9 * Cin_p, Cout_p).astype(jnp.bfloat16)
    w2 = jnp.pad(params["w2"], ((0, 0), (0, 0), (0, Cout_p - Cout), (0, Cout_p - Cout))
                 ).reshape(9 * Cout_p, Cout_p).astype(jnp.bfloat16)
    wd = params.get("wd")
    if wd is not None:
        wd = jnp.pad(wd, ((0, 0), (0, 0), (0, Cin_p - Cin), (0, Cout_p - Cout))
                     ).reshape(Cin_p, Cout_p).astype(jnp.bfloat16)

    # ---- pipeline ----
    ss1 = bn_stats_scale_shift(x_slab, g1, b1, count)                 # bn1 stats

    conv1_outs = conv1_bn_fused(x_slab, w1, ss1, mask_img, N, H, Wp,  # bn1+relu1+conv1
                                emit_act1=pre_res_act)                # (+bn2 stats)
    if pre_res_act:
        r1, stats2, act1 = conv1_outs
        shortcut, has_ring = act1, False
    else:
        r1, stats2 = conv1_outs
        shortcut, has_ring = x_slab, True

    # BN2 finalize (tiny, plain XLA on (2, Cout_p) data)
    st = stats2.reshape(N, 8, Cout_p)
    s_sum = jnp.sum(st[:, 0:1, :], axis=0).reshape(1, Cout_p)
    s_sq = jnp.sum(st[:, 1:2, :], axis=0).reshape(1, Cout_p)
    mean = s_sum / count
    var = s_sq / count - mean * mean
    scale2 = g2 * jax.lax.rsqrt(var + EPS)
    shift2 = b2 - mean * scale2
    ss2 = jnp.concatenate([scale2, shift2], axis=0)

    out = conv2_bn_shortcut(r1, w2, ss2, mask_int, shortcut, wd,      # bn2+relu2+conv2
                            N, H, Wp, has_ring)                       # +shortcut+add

    out = out.reshape(N, H, Wp, Cout_p)[:, :, 1:W + 1, :Cout]
    return jnp.transpose(out, (0, 3, 1, 2))


# ---------------------------------------------------------------------------
# pure-JAX reference for correctness checking
# ---------------------------------------------------------------------------
def reference_forward(x_nchw, params, pre_res_act=False):
    x = jnp.transpose(x_nchw, (0, 2, 3, 1))

    def bn_leaky_ref(v, gamma, beta):
        mean = jnp.mean(v, axis=(0, 1, 2), keepdims=True)
        var = jnp.mean(jnp.square(v - mean), axis=(0, 1, 2), keepdims=True)
        y = (v - mean) * jax.lax.rsqrt(var + EPS) * gamma.reshape(1, 1, 1, -1) \
            + beta.reshape(1, 1, 1, -1)
        return jnp.where(y >= 0, y, NEG_SLOPE * y)

    dn = ("NHWC", "HWIO", "NHWC")
    act1 = bn_leaky_ref(x, params["gamma1"], params["beta1"])
    r = jax.lax.conv_general_dilated(act1, params["w1"], (1, 1), "SAME", dimension_numbers=dn)
    r = bn_leaky_ref(r, params["gamma2"], params["beta2"])
    r = jax.lax.conv_general_dilated(r, params["w2"], (1, 1), "SAME", dimension_numbers=dn)
    sc = act1 if pre_res_act else x
    if params.get("wd") is not None:
        sc = jax.lax.conv_general_dilated(sc, params["wd"], (1, 1), "VALID", dimension_numbers=dn)
    return jnp.transpose(sc + r, (0, 3, 1, 2))


def _make_params(key, cin, cout, with_down):
    ks = jax.random.split(key, 8)
    p = {
        "gamma1": 1.0 + 0.1 * jax.random.normal(ks[1], (1, cin), jnp.float32),
        "beta1": 0.1 * jax.random.normal(ks[2], (1, cin), jnp.float32),
        "w1": jax.random.normal(ks[3], (3, 3, cin, cout), jnp.float32) * np.sqrt(2.0 / (9 * cin)),
        "gamma2": 1.0 + 0.1 * jax.random.normal(ks[4], (1, cout), jnp.float32),
        "beta2": 0.1 * jax.random.normal(ks[5], (1, cout), jnp.float32),
        "w2": jax.random.normal(ks[6], (3, 3, cout, cout), jnp.float32) * np.sqrt(2.0 / (9 * cout)),
        "wd": (jax.random.normal(ks[7], (1, 1, cin, cout), jnp.float32) * np.sqrt(2.0 / cin))
              if with_down else None,
    }
    return p


if __name__ == "__main__":
    key = jax.random.PRNGKey(0)
    k1, k2, k3, k4 = jax.random.split(key, 4)

    # config 1: in_chan != out_chan, stride=1  =>  1x1-conv downsample, pre_res_act=False
    N, Cin, Cout, H, W = 2, 4, 8, 16, 16
    x1 = jax.random.normal(k1, (N, Cin, H, W), jnp.float32)
    p1 = _make_params(k2, Cin, Cout, with_down=True)
    out1 = jax.block_until_ready(basic_block_preact_forward(x1, p1, pre_res_act=False))
    ref1 = jax.block_until_ready(reference_forward(x1, p1, pre_res_act=False))
    assert out1.shape == (N, Cout, H, W)
    # tolerance reflects bf16 MXU operands / bf16 intermediate storage vs an f32 reference
    np.testing.assert_allclose(np.asarray(out1), np.asarray(ref1), rtol=5e-2, atol=5e-2)

    # config 2: in_chan == out_chan, stride=1  =>  identity shortcut, pre_res_act=True
    x2 = jax.random.normal(k3, (N, Cout, H, W), jnp.float32)
    p2 = _make_params(k4, Cout, Cout, with_down=False)
    out2 = jax.block_until_ready(basic_block_preact_forward(x2, p2, pre_res_act=True))
    ref2 = jax.block_until_ready(reference_forward(x2, p2, pre_res_act=True))
    assert out2.shape == (N, Cout, H, W)
    np.testing.assert_allclose(np.asarray(out2), np.asarray(ref2), rtol=5e-2, atol=5e-2)

    print("KERNEL_OK")
</pallas_src>

<mosaic_0001>
module attributes {stable_mosaic.version = 11 : i64} {
  func.func @kernel(%arg0: i32, %arg1: memref<960x128xf32, #tpu.memory_space<vmem>>, %arg2: memref<1x128xf32, #tpu.memory_space<vmem>>, %arg3: memref<1x128xf32, #tpu.memory_space<vmem>>, %arg4: memref<2x128xf32, #tpu.memory_space<vmem>>) attributes {dimension_semantics = [#tpu.dimension_semantics<arbitrary>], iteration_bounds = array<i64: 1>, scalar_prefetch = 0 : i64, scratch_operands = 0 : i64, tpu.core_type = #tpu.core_type<tc>, window_params = [{transform_indices = @transform_0, window_bounds = array<i64: 960, 128>}, {pipeline_mode = #tpu.pipeline_mode<synchronous>, transform_indices = @transform_1, window_bounds = array<i64: 1, 128>}, {pipeline_mode = #tpu.pipeline_mode<synchronous>, transform_indices = @transform_2, window_bounds = array<i64: 1, 128>}, {pipeline_mode = #tpu.pipeline_mode<synchronous>, transform_indices = @transform_3, window_bounds = array<i64: 2, 128>}]} {
    %c0_i32 = arith.constant 0 : i32
    %0 = arith.cmpi eq, %arg0, %c0_i32 : i32
    %1 = arith.extui %0 : i1 to i32
    %c0_i32_0 = arith.constant 0 : i32
    %2 = arith.cmpi ne, %1, %c0_i32_0 : i32
    scf.if %2 {
      %cst_12 = arith.constant 0.000000e+00 : f32
      %18 = vector.broadcast %cst_12 : f32 to vector<2x128xf32>
      %c0_13 = arith.constant 0 : index
      %c0_14 = arith.constant 0 : index
      %19 = vector.load %arg4[%c0_13, %c0_14] : memref<2x128xf32, #tpu.memory_space<vmem>>, vector<2x128xf32>
      tpu.vector_store %arg4[%c0_13, %c0_14], %18 {strides = array<i32>} : memref<2x128xf32, #tpu.memory_space<vmem>>, vector<2x128xf32>,
    } else {
    }
    %c0 = arith.constant 0 : index
    %c0_1 = arith.constant 0 : index
    %3 = vector.load %arg1[%c0, %c0_1] : memref<960x128xf32, #tpu.memory_space<vmem>>, vector<960x128xf32>
    %c0_2 = arith.constant 0 : index
    %c0_3 = arith.constant 0 : index
    %4 = vector.load %arg4[%c0_2, %c0_3] : memref<2x128xf32, #tpu.memory_space<vmem>>, vector<1x128xf32>
    %cst = arith.constant dense<0.000000e+00> : vector<128xf32>
    %5 = vector.multi_reduction <add>, %3, %cst [0] : vector<960x128xf32> to vector<128xf32>
    %6 = vector.shape_cast %5 : vector<128xf32> to vector<1x128xf32>
    %7 = arith.addf %4, %6 : vector<1x128xf32>
    %c0_4 = arith.constant 0 : index
    %c0_5 = arith.constant 0 : index
    %8 = vector.load %arg4[%c0_4, %c0_5] : memref<2x128xf32, #tpu.memory_space<vmem>>, vector<1x128xf32>
    tpu.vector_store %arg4[%c0_4, %c0_5], %7 {strides = array<i32>} : memref<2x128xf32, #tpu.memory_space<vmem>>, vector<1x128xf32>,
    %c1 = arith.constant 1 : index
    %c0_6 = arith.constant 0 : index
    %9 = vector.load %arg4[%c1, %c0_6] : memref<2x128xf32, #tpu.memory_space<vmem>>, vector<1x128xf32>
    %10 = arith.mulf %3, %3 : vector<960x128xf32>
    %cst_7 = arith.constant dense<0.000000e+00> : vector<128xf32>
    %11 = vector.multi_reduction <add>, %10, %cst_7 [0] : vector<960x128xf32> to vector<128xf32>
    %12 = vector.shape_cast %11 : vector<128xf32> to vector<1x128xf32>
    %13 = arith.addf %9, %12 : vector<1x128xf32>
    %c1_8 = arith.constant 1 : index
    %c0_9 = arith.constant 0 : index
    %14 = vector.load %arg4[%c1_8, %c0_9] : memref<2x128xf32, #tpu.memory_space<vmem>>, vector<1x128xf32>
    tpu.vector_store %arg4[%c1_8, %c0_9], %13 {strides = array<i32>} : memref<2x128xf32, #tpu.memory_space<vmem>>, vector<1x128xf32>,
    %c0_i32_10 = arith.constant 0 : i32
    %15 = arith.cmpi eq, %arg0, %c0_i32_10 : i32
    %16 = arith.extui %15 : i1 to i32
    %c0_i32_11 = arith.constant 0 : i32
    %17 = arith.cmpi ne, %16, %c0_i32_11 : i32
    scf.if %17 {
      %c0_12 = arith.constant 0 : index
      %c0_13 = arith.constant 0 : index
      %18 = vector.load %arg4[%c0_12, %c0_13] : memref<2x128xf32, #tpu.memory_space<vmem>>, vector<1x128xf32>
      %cst_14 = arith.constant 0.001953125 : f32
      %19 = vector.broadcast %cst_14 : f32 to vector<1x128xf32>
      %20 = arith.mulf %18, %19 : vector<1x128xf32>
      %c1_15 = arith.constant 1 : index
      %c0_16 = arith.constant 0 : index
      %21 = vector.load %arg4[%c1_15, %c0_16] : memref<2x128xf32, #tpu.memory_space<vmem>>, vector<1x128xf32>
      %cst_17 = arith.constant 0.001953125 : f32
      %22 = vector.broadcast %cst_17 : f32 to vector<1x128xf32>
      %23 = arith.mulf %21, %22 : vector<1x128xf32>
      %24 = arith.mulf %20, %20 : vector<1x128xf32>
      %25 = arith.subf %23, %24 : vector<1x128xf32>
      %c0_18 = arith.constant 0 : index
      %c0_19 = arith.constant 0 : index
      %26 = vector.load %arg2[%c0_18, %c0_19] : memref<1x128xf32, #tpu.memory_space<vmem>>, vector<1x128xf32>
      %cst_20 = arith.constant 9.99999974E-6 : f32
      %27 = vector.broadcast %cst_20 : f32 to vector<1x128xf32>
      %28 = arith.addf %25, %27 : vector<1x128xf32>
      %29 = math.rsqrt %28 : vector<1x128xf32>
      %30 = arith.mulf %26, %29 : vector<1x128xf32>
      %c0_21 = arith.constant 0 : index
      %c0_22 = arith.constant 0 : index
      %31 = vector.load %arg4[%c0_21, %c0_22] : memref<2x128xf32, #tpu.memory_space<vmem>>, vector<1x128xf32>
      tpu.vector_store %arg4[%c0_21, %c0_22], %30 {strides = array<i32>} : memref<2x128xf32, #tpu.memory_space<vmem>>, vector<1x128xf32>,
      %c0_23 = arith.constant 0 : index
      %c0_24 = arith.constant 0 : index
      %32 = vector.load %arg3[%c0_23, %c0_24] : memref<1x128xf32, #tpu.memory_space<vmem>>, vector<1x128xf32>
      %33 = arith.mulf %20, %30 : vector<1x128xf32>
      %34 = arith.subf %32, %33 : vector<1x128xf32>
      %c1_25 = arith.constant 1 : index
      %c0_26 = arith.constant 0 : index
      %35 = vector.load %arg4[%c1_25, %c0_26] : memref<2x128xf32, #tpu.memory_space<vmem>>, vector<1x128xf32>
      tpu.vector_store %arg4[%c1_25, %c0_26], %34 {strides = array<i32>} : memref<2x128xf32, #tpu.memory_space<vmem>>, vector<1x128xf32>,
    } else {
    }
    return
  }
  func.func @transform_0(%arg0: i32) -> (i32, i32) {
    %c0_i32 = arith.constant 0 : i32
    %c0_i32_0 = arith.constant 0 : i32
    return %arg0, %c0_i32 : i32, i32
  }
  func.func @transform_1(%arg0: i32) -> (i32, i32) {
    %c0_i32 = arith.constant 0 : i32
    %c0_i32_0 = arith.constant 0 : i32
    %c0_i32_1 = arith.constant 0 : i32
    return %c0_i32, %c0_i32_0 : i32, i32
  }
  func.func @transform_2(%arg0: i32) -> (i32, i32) {
    %c0_i32 = arith.constant 0 : i32
    %c0_i32_0 = arith.constant 0 : i32
    %c0_i32_1 = arith.constant 0 : i32
    return %c0_i32, %c0_i32_0 : i32, i32
  }
  func.func @transform_3(%arg0: i32) -> (i32, i32) {
    %c0_i32 = arith.constant 0 : i32
    %c0_i32_0 = arith.constant 0 : i32
    %c0_i32_1 = arith.constant 0 : i32
    return %c0_i32, %c0_i32_0 : i32, i32
  }
}

</mosaic_0001>

<bundles_post_ra>
// kernel: tpu_custom_call.1
= control target key start
LH: loop header
LB: loop body
LE: loop exit
PB: predicated region body
PF: predicated region fallthrough
CT: control target
= control target key end

     0   :  { %8 = vsyncpa [#allocation3], 0  ;;  %s651_s0 = inlined_call_operand.hbm [shape: f32[960,128], index: 0, kind: input, shape index: {}]   ;;  %s652_s1 = inlined_call_operand.vmem [shape: f32[1,128], index: 1, kind: input, shape index: {}]   ;;  %s653_s2 = inlined_call_operand.vmem [shape: f32[1,128], index: 2, kind: input, shape index: {}]   ;;  %s654_s3 = inlined_call_operand.hbm [shape: f32[2,128], index: 3, kind: output, shape index: {}]  }
   0x1   :  { %9 = vsyncpa [#allocation4], 0  ;;  %s614_s12 = smov [#allocation2]  }
   0x2   :  { %s15_s13 = sshll.u32 %s614_s12, 4  ;;  %s16_s13 = int_to_ptr.vmem [resolvable:$true] %s15_s13 }
   0x3   :  { %s578_s14 = scalar_lea.vmem %s16_s13, 15360  ;;  %p583_p1 = scmp.lt.s32.totalorder %s16_s13, %s16_s13 }
   0x4   :  { %p579_p0 = scmp.ne.s32.totalorder %s16_s13, %s578_s14  ;;  %p584_p2 = scmp.lt.s32.totalorder %s578_s14, %s578_s14 }
   0x6   :  { %p585_p3 = por %p584_p2, %p583_p1 }
   0x8   :  { %p586_p4 = pnand %p585_p3, %p579_p0 }
   0xa   :  { %589 = shalt.err (!%p586_p4)
}
   0xb   :  { %s615_s15 = smov 128   ;;  %s616_s16 = smov 8  }
   0xc   :  { %21 = dma.hbm_to_vmem [thread:$0]  %s651_s0, 15360, %s16_s13, [#allocation3], %s615_s15, %s615_s15, %s616_s16  }
   0xd   :  { %610 = dma.done.wait [#allocation3], 15360  }
   0xe   :  { %611 = vsyncadd [#allocation3], 4294951936  ;;  %v617_v0 = vmov 0.0   ;;  %v34_v1 = vld [vmem:[#allocation2] sm:$0xff]  ;;  %v35_v2 = vld [vmem:[#allocation2 + $0x8] sm:$0xff]  ;;  %s618_s22 = smov [#allocation5]  }
   0xf   :  { %33 = vst [vmem:[#allocation5] sm:$0x3] %v617_v0  ;;  %v36_v3 = vld [vmem:[#allocation2 + $0x10] sm:$0xff]  ;;  %v37_v4 = vld [vmem:[#allocation2 + $0x18] sm:$0xff]  ;;  %v155_v5 = vadd.f32 %v35_v2, %v34_v1  ;;  %v283_v6 = vmul.f32 %v34_v1, %v34_v1  ;;  %v284_v7 = vmul.f32 %v35_v2, %v35_v2  ;;  %v38_v9 = vld [vmem:[#allocation2 + $0x20] sm:$0xff]  ;;  %s554_s23 = sshll.u32 %s618_s22, 4  ;;  %s555_s23 = int_to_ptr.vmem [resolvable:$true] %s554_s23 }
  0x10   :  { %v285_v8 = vmul.f32 %v36_v3, %v36_v3  ;;  %v286_v11 = vmul.f32 %v37_v4, %v37_v4  ;;  %v39_v13 = vld [vmem:[#allocation2 + $0x28] sm:$0xff]  ;;  %v287_v15 = vmul.f32 %v38_v9, %v38_v9  ;;  %v40_v17 = vld [vmem:[#allocation2 + $0x30] sm:$0xff]  ;;  %v41_v21 = vld [vmem:[#allocation2 + $0x38] sm:$0xff]  ;;  %s590_s24 = scalar_lea.vmem %s555_s23, 32  ;;  %p595_p6 = scmp.lt.s32.totalorder %s555_s23, %s555_s23 }
  0x11   :  { %v156_v10 = vadd.f32 %v155_v5, %v36_v3  ;;  %v403_v12 = vadd.f32 %v284_v7, %v283_v6  ;;  %v288_v19 = vmul.f32 %v39_v13, %v39_v13  ;;  %v289_v23 = vmul.f32 %v40_v17, %v40_v17  ;;  %v42_v25 = vld [vmem:[#allocation2 + $0x40] sm:$0xff]  ;;  %v43_v29 = vld [vmem:[#allocation2 + $0x48] sm:$0xff]  ;;  %v44_v33 = vld [vmem:[#allocation2 + $0x50] sm:$0xff]  ;;  %p591_p5 = scmp.ne.s32.totalorder %s555_s23, %s590_s24  ;;  %p596_p7 = scmp.lt.s32.totalorder %s590_s24, %s590_s24 }
  0x12   :  { %v290_v27 = vmul.f32 %v41_v21, %v41_v21  ;;  %v291_v31 = vmul.f32 %v42_v25, %v42_v25  ;;  %v292_v35 = vmul.f32 %v43_v29, %v43_v29  ;;  %v45_v37 = vld [vmem:[#allocation2 + $0x58] sm:$0xff]  ;;  %v293_v39 = vmul.f32 %v44_v33, %v44_v33  ;;  %v46_v41 = vld [vmem:[#allocation2 + $0x60] sm:$0xff]  ;;  %v47_v45 = vld [vmem:[#allocation2 + $0x68] sm:$0xff] }
  0x13   :  { %v157_v14 = vadd.f32 %v156_v10, %v37_v4  ;;  %v404_v16 = vadd.f32 %v403_v12, %v285_v8  ;;  %v294_v43 = vmul.f32 %v45_v37, %v45_v37  ;;  %v295_v47 = vmul.f32 %v46_v41, %v46_v41  ;;  %v48_v49 = vld [vmem:[#allocation2 + $0x70] sm:$0xff]  ;;  %v49_v53 = vld [vmem:[#allocation2 + $0x78] sm:$0xff]  ;;  %v50_v57 = vld [vmem:[#allocation2 + $0x80] sm:$0xff]  ;;  %p597_p8 = por %p596_p7, %p595_p6 }
  0x14   :  { %v296_v51 = vmul.f32 %v47_v45, %v47_v45  ;;  %v297_v55 = vmul.f32 %v48_v49, %v48_v49  ;;  %v298_v59 = vmul.f32 %v49_v53, %v49_v53  ;;  %v51_v61 = vld [vmem:[#allocation2 + $0x88] sm:$0xff]  ;;  %v299_v63 = vmul.f32 %v50_v57, %v50_v57  ;;  %v52_v1 = vld [vmem:[#allocation2 + $0x90] sm:$0xff]  ;;  %v53_v5 = vld [vmem:[#allocation2 + $0x98] sm:$0xff] }
  0x15   :  { %v158_v18 = vadd.f32 %v157_v14, %v38_v9  ;;  %v405_v20 = vadd.f32 %v404_v16, %v286_v11  ;;  %v300_v3 = vmul.f32 %v51_v61, %v51_v61  ;;  %v301_v7 = vmul.f32 %v52_v1, %v52_v1  ;;  %v54_v9 = vld [vmem:[#allocation2 + $0xa0] sm:$0xff]  ;;  %p598_p9 = pnand %p597_p8, %p591_p5 }
  0x16   :  { %v302_v11 = vmul.f32 %v53_v5, %v53_v5 }
  0x17   :  { %v159_v22 = vadd.f32 %v158_v18, %v39_v13  ;;  %v406_v24 = vadd.f32 %v405_v20, %v287_v15  ;;  %v55_v13 = vld [vmem:[#allocation2 + $0xa8] sm:$0xff]  ;;  %v303_v15 = vmul.f32 %v54_v9, %v54_v9 }
  0x19   :  { %v160_v26 = vadd.f32 %v159_v22, %v40_v17  ;;  %v407_v28 = vadd.f32 %v406_v24, %v288_v19  ;;  %v56_v17 = vld [vmem:[#allocation2 + $0xb0] sm:$0xff]  ;;  %v304_v19 = vmul.f32 %v55_v13, %v55_v13 }
  0x1b   :  { %v161_v30 = vadd.f32 %v160_v26, %v41_v21  ;;  %v408_v32 = vadd.f32 %v407_v28, %v289_v23  ;;  %v57_v21 = vld [vmem:[#allocation2 + $0xb8] sm:$0xff]  ;;  %v305_v23 = vmul.f32 %v56_v17, %v56_v17 }
  0x1d   :  { %v162_v34 = vadd.f32 %v161_v30, %v42_v25  ;;  %v409_v36 = vadd.f32 %v408_v32, %v290_v27  ;;  %v58_v25 = vld [vmem:[#allocation2 + $0xc0] sm:$0xff]  ;;  %v306_v27 = vmul.f32 %v57_v21, %v57_v21 }
  0x1f   :  { %v163_v38 = vadd.f32 %v162_v34, %v43_v29  ;;  %v410_v40 = vadd.f32 %v409_v36, %v291_v31  ;;  %v59_v29 = vld [vmem:[#allocation2 + $0xc8] sm:$0xff]  ;;  %v307_v31 = vmul.f32 %v58_v25, %v58_v25 }
  0x21   :  { %v164_v42 = vadd.f32 %v163_v38, %v44_v33  ;;  %v411_v44 = vadd.f32 %v410_v40, %v292_v35  ;;  %v60_v33 = vld [vmem:[#allocation2 + $0xd0] sm:$0xff]  ;;  %v308_v35 = vmul.f32 %v59_v29, %v59_v29 }
  0x23   :  { %v165_v46 = vadd.f32 %v164_v42, %v45_v37  ;;  %v412_v48 = vadd.f32 %v411_v44, %v293_v39  ;;  %v61_v37 = vld [vmem:[#allocation2 + $0xd8] sm:$0xff]  ;;  %v309_v39 = vmul.f32 %v60_v33, %v60_v33 }
  0x25   :  { %v166_v50 = vadd.f32 %v165_v46, %v46_v41  ;;  %v413_v52 = vadd.f32 %v412_v48, %v294_v43  ;;  %v62_v41 = vld [vmem:[#allocation2 + $0xe0] sm:$0xff]  ;;  %v310_v43 = vmul.f32 %v61_v37, %v61_v37 }
  0x27   :  { %v167_v54 = vadd.f32 %v166_v50, %v47_v45  ;;  %v414_v56 = vadd.f32 %v413_v52, %v295_v47  ;;  %v63_v45 = vld [vmem:[#allocation2 + $0xe8] sm:$0xff]  ;;  %v311_v47 = vmul.f32 %v62_v41, %v62_v41 }
  0x29   :  { %v168_v58 = vadd.f32 %v167_v54, %v48_v49  ;;  %v415_v60 = vadd.f32 %v414_v56, %v296_v51  ;;  %v64_v49 = vld [vmem:[#allocation2 + $0xf0] sm:$0xff]  ;;  %v312_v51 = vmul.f32 %v63_v45, %v63_v45 }
  0x2b   :  { %v169_v62 = vadd.f32 %v168_v58, %v49_v53  ;;  %v416_v0 = vadd.f32 %v415_v60, %v297_v55  ;;  %v65_v53 = vld [vmem:[#allocation2 + $0xf8] sm:$0xff]  ;;  %v313_v55 = vmul.f32 %v64_v49, %v64_v49 }
  0x2d   :  { %v170_v2 = vadd.f32 %v169_v62, %v50_v57  ;;  %v417_v4 = vadd.f32 %v416_v0, %v298_v59  ;;  %v66_v57 = vld [vmem:[#allocation2 + $0x100] sm:$0xff]  ;;  %v314_v59 = vmul.f32 %v65_v53, %v65_v53 }
  0x2f   :  { %v171_v6 = vadd.f32 %v170_v2, %v51_v61  ;;  %v418_v8 = vadd.f32 %v417_v4, %v299_v63  ;;  %v67_v61 = vld [vmem:[#allocation2 + $0x108] sm:$0xff]  ;;  %v315_v63 = vmul.f32 %v66_v57, %v66_v57 }
  0x31   :  { %v172_v10 = vadd.f32 %v171_v6, %v52_v1  ;;  %v419_v12 = vadd.f32 %v418_v8, %v300_v3  ;;  %v68_v1 = vld [vmem:[#allocation2 + $0x110] sm:$0xff]  ;;  %v316_v3 = vmul.f32 %v67_v61, %v67_v61 }
  0x33   :  { %v173_v14 = vadd.f32 %v172_v10, %v53_v5  ;;  %v420_v16 = vadd.f32 %v419_v12, %v301_v7  ;;  %v69_v5 = vld [vmem:[#allocation2 + $0x118] sm:$0xff]  ;;  %v317_v7 = vmul.f32 %v68_v1, %v68_v1 }
  0x35   :  { %v174_v18 = vadd.f32 %v173_v14, %v54_v9  ;;  %v421_v20 = vadd.f32 %v420_v16, %v302_v11  ;;  %v70_v9 = vld [vmem:[#allocation2 + $0x120] sm:$0xff]  ;;  %v318_v11 = vmul.f32 %v69_v5, %v69_v5 }
  0x37   :  { %v175_v22 = vadd.f32 %v174_v18, %v55_v13  ;;  %v422_v24 = vadd.f32 %v421_v20, %v303_v15  ;;  %v71_v13 = vld [vmem:[#allocation2 + $0x128] sm:$0xff]  ;;  %v319_v15 = vmul.f32 %v70_v9, %v70_v9 }
  0x39   :  { %v176_v26 = vadd.f32 %v175_v22, %v56_v17  ;;  %v423_v28 = vadd.f32 %v422_v24, %v304_v19  ;;  %v72_v17 = vld [vmem:[#allocation2 + $0x130] sm:$0xff]  ;;  %v320_v19 = vmul.f32 %v71_v13, %v71_v13 }
  0x3b   :  { %v177_v30 = vadd.f32 %v176_v26, %v57_v21  ;;  %v424_v32 = vadd.f32 %v423_v28, %v305_v23  ;;  %v73_v21 = vld [vmem:[#allocation2 + $0x138] sm:$0xff]  ;;  %v321_v23 = vmul.f32 %v72_v17, %v72_v17 }
  0x3d   :  { %v178_v34 = vadd.f32 %v177_v30, %v58_v25  ;;  %v425_v36 = vadd.f32 %v424_v32, %v306_v27  ;;  %v74_v25 = vld [vmem:[#allocation2 + $0x140] sm:$0xff]  ;;  %v322_v27 = vmul.f32 %v73_v21, %v73_v21 }
  0x3f   :  { %v179_v38 = vadd.f32 %v178_v34, %v59_v29  ;;  %v426_v40 = vadd.f32 %v425_v36, %v307_v31  ;;  %v75_v29 = vld [vmem:[#allocation2 + $0x148] sm:$0xff]  ;;  %v323_v31 = vmul.f32 %v74_v25, %v74_v25 }
  0x41   :  { %v180_v42 = vadd.f32 %v179_v38, %v60_v33  ;;  %v427_v44 = vadd.f32 %v426_v40, %v308_v35  ;;  %v76_v33 = vld [vmem:[#allocation2 + $0x150] sm:$0xff]  ;;  %v324_v35 = vmul.f32 %v75_v29, %v75_v29 }
  0x43   :  { %v181_v46 = vadd.f32 %v180_v42, %v61_v37  ;;  %v428_v48 = vadd.f32 %v427_v44, %v309_v39  ;;  %v77_v37 = vld [vmem:[#allocation2 + $0x158] sm:$0xff]  ;;  %v325_v39 = vmul.f32 %v76_v33, %v76_v33 }
  0x45   :  { %v182_v50 = vadd.f32 %v181_v46, %v62_v41  ;;  %v429_v52 = vadd.f32 %v428_v48, %v310_v43  ;;  %v78_v41 = vld [vmem:[#allocation2 + $0x160] sm:$0xff]  ;;  %v326_v43 = vmul.f32 %v77_v37, %v77_v37 }
  0x47   :  { %v183_v54 = vadd.f32 %v182_v50, %v63_v45  ;;  %v430_v56 = vadd.f32 %v429_v52, %v311_v47  ;;  %v79_v45 = vld [vmem:[#allocation2 + $0x168] sm:$0xff]  ;;  %v327_v47 = vmul.f32 %v78_v41, %v78_v41 }
  0x49   :  { %v184_v58 = vadd.f32 %v183_v54, %v64_v49  ;;  %v431_v60 = vadd.f32 %v430_v56, %v312_v51  ;;  %v80_v49 = vld [vmem:[#allocation2 + $0x170] sm:$0xff]  ;;  %v328_v51 = vmul.f32 %v79_v45, %v79_v45 }
  0x4b   :  { %v185_v62 = vadd.f32 %v184_v58, %v65_v53  ;;  %v432_v0 = vadd.f32 %v431_v60, %v313_v55  ;;  %v81_v53 = vld [vmem:[#allocation2 + $0x178] sm:$0xff]  ;;  %v329_v55 = vmul.f32 %v80_v49, %v80_v49 }
  0x4d   :  { %v186_v2 = vadd.f32 %v185_v62, %v66_v57  ;;  %v433_v4 = vadd.f32 %v432_v0, %v314_v59  ;;  %v82_v57 = vld [vmem:[#allocation2 + $0x180] sm:$0xff]  ;;  %v330_v59 = vmul.f32 %v81_v53, %v81_v53 }
  0x4f   :  { %v187_v6 = vadd.f32 %v186_v2, %v67_v61  ;;  %v434_v8 = vadd.f32 %v433_v4, %v315_v63  ;;  %v83_v61 = vld [vmem:[#allocation2 + $0x188] sm:$0xff]  ;;  %v331_v63 = vmul.f32 %v82_v57, %v82_v57 }
  0x51   :  { %v188_v10 = vadd.f32 %v187_v6, %v68_v1  ;;  %v435_v12 = vadd.f32 %v434_v8, %v316_v3  ;;  %v84_v1 = vld [vmem:[#allocation2 + $0x190] sm:$0xff]  ;;  %v332_v3 = vmul.f32 %v83_v61, %v83_v61 }
  0x53   :  { %v189_v14 = vadd.f32 %v188_v10, %v69_v5  ;;  %v436_v16 = vadd.f32 %v435_v12, %v317_v7  ;;  %v85_v5 = vld [vmem:[#allocation2 + $0x198] sm:$0xff]  ;;  %v333_v7 = vmul.f32 %v84_v1, %v84_v1 }
  0x55   :  { %v190_v18 = vadd.f32 %v189_v14, %v70_v9  ;;  %v437_v20 = vadd.f32 %v436_v16, %v318_v11  ;;  %v86_v9 = vld [vmem:[#allocation2 + $0x1a0] sm:$0xff]  ;;  %v334_v11 = vmul.f32 %v85_v5, %v85_v5 }
  0x57   :  { %v191_v22 = vadd.f32 %v190_v18, %v71_v13  ;;  %v438_v24 = vadd.f32 %v437_v20, %v319_v15  ;;  %v87_v13 = vld [vmem:[#allocation2 + $0x1a8] sm:$0xff]  ;;  %v335_v15 = vmul.f32 %v86_v9, %v86_v9 }
  0x59   :  { %v192_v26 = vadd.f32 %v191_v22, %v72_v17  ;;  %v439_v28 = vadd.f32 %v438_v24, %v320_v19  ;;  %v88_v17 = vld [vmem:[#allocation2 + $0x1b0] sm:$0xff]  ;;  %v336_v19 = vmul.f32 %v87_v13, %v87_v13 }
  0x5b   :  { %v193_v30 = vadd.f32 %v192_v26, %v73_v21  ;;  %v440_v32 = vadd.f32 %v439_v28, %v321_v23  ;;  %v89_v21 = vld [vmem:[#allocation2 + $0x1b8] sm:$0xff]  ;;  %v337_v23 = vmul.f32 %v88_v17, %v88_v17 }
  0x5d   :  { %v194_v34 = vadd.f32 %v193_v30, %v74_v25  ;;  %v441_v36 = vadd.f32 %v440_v32, %v322_v27  ;;  %v90_v25 = vld [vmem:[#allocation2 + $0x1c0] sm:$0xff]  ;;  %v338_v27 = vmul.f32 %v89_v21, %v89_v21 }
  0x5f   :  { %v195_v38 = vadd.f32 %v194_v34, %v75_v29  ;;  %v442_v40 = vadd.f32 %v441_v36, %v323_v31  ;;  %v91_v29 = vld [vmem:[#allocation2 + $0x1c8] sm:$0xff]  ;;  %v339_v31 = vmul.f32 %v90_v25, %v90_v25 }
  0x61   :  { %v196_v42 = vadd.f32 %v195_v38, %v76_v33  ;;  %v443_v44 = vadd.f32 %v442_v40, %v324_v35  ;;  %v92_v33 = vld [vmem:[#allocation2 + $0x1d0] sm:$0xff]  ;;  %v340_v35 = vmul.f32 %v91_v29, %v91_v29 }
  0x63   :  { %v197_v46 = vadd.f32 %v196_v42, %v77_v37  ;;  %v444_v48 = vadd.f32 %v443_v44, %v325_v39  ;;  %v93_v37 = vld [vmem:[#allocation2 + $0x1d8] sm:$0xff]  ;;  %v341_v39 = vmul.f32 %v92_v33, %v92_v33 }
  0x65   :  { %v198_v50 = vadd.f32 %v197_v46, %v78_v41  ;;  %v445_v52 = vadd.f32 %v444_v48, %v326_v43  ;;  %v94_v41 = vld [vmem:[#allocation2 + $0x1e0] sm:$0xff]  ;;  %v342_v43 = vmul.f32 %v93_v37, %v93_v37 }
  0x67   :  { %v199_v54 = vadd.f32 %v198_v50, %v79_v45  ;;  %v446_v56 = vadd.f32 %v445_v52, %v327_v47  ;;  %v95_v45 = vld [vmem:[#allocation2 + $0x1e8] sm:$0xff]  ;;  %v343_v47 = vmul.f32 %v94_v41, %v94_v41 }
  0x69   :  { %v200_v58 = vadd.f32 %v199_v54, %v80_v49  ;;  %v447_v60 = vadd.f32 %v446_v56, %v328_v51  ;;  %v96_v49 = vld [vmem:[#allocation2 + $0x1f0] sm:$0xff]  ;;  %v344_v51 = vmul.f32 %v95_v45, %v95_v45 }
  0x6b   :  { %v201_v62 = vadd.f32 %v200_v58, %v81_v53  ;;  %v448_v0 = vadd.f32 %v447_v60, %v329_v55  ;;  %v97_v53 = vld [vmem:[#allocation2 + $0x1f8] sm:$0xff]  ;;  %v345_v55 = vmul.f32 %v96_v49, %v96_v49 }
  0x6d   :  { %v202_v2 = vadd.f32 %v201_v62, %v82_v57  ;;  %v449_v4 = vadd.f32 %v448_v0, %v330_v59  ;;  %v98_v57 = vld [vmem:[#allocation2 + $0x200] sm:$0xff]  ;;  %v346_v59 = vmul.f32 %v97_v53, %v97_v53 }
  0x6f   :  { %v203_v6 = vadd.f32 %v202_v2, %v83_v61  ;;  %v450_v8 = vadd.f32 %v449_v4, %v331_v63  ;;  %v99_v61 = vld [vmem:[#allocation2 + $0x208] sm:$0xff]  ;;  %v347_v63 = vmul.f32 %v98_v57, %v98_v57 }
  0x71   :  { %v204_v10 = vadd.f32 %v203_v6, %v84_v1  ;;  %v451_v12 = vadd.f32 %v450_v8, %v332_v3  ;;  %v100_v1 = vld [vmem:[#allocation2 + $0x210] sm:$0xff]  ;;  %v348_v3 = vmul.f32 %v99_v61, %v99_v61 }
  0x73   :  { %v205_v14 = vadd.f32 %v204_v10, %v85_v5  ;;  %v452_v16 = vadd.f32 %v451_v12, %v333_v7  ;;  %v101_v5 = vld [vmem:[#allocation2 + $0x218] sm:$0xff]  ;;  %v349_v7 = vmul.f32 %v100_v1, %v100_v1 }
  0x75   :  { %v206_v18 = vadd.f32 %v205_v14, %v86_v9  ;;  %v453_v20 = vadd.f32 %v452_v16, %v334_v11  ;;  %v102_v9 = vld [vmem:[#allocation2 + $0x220] sm:$0xff]  ;;  %v350_v11 = vmul.f32 %v101_v5, %v101_v5 }
  0x77   :  { %v207_v22 = vadd.f32 %v206_v18, %v87_v13  ;;  %v454_v24 = vadd.f32 %v453_v20, %v335_v15  ;;  %v103_v13 = vld [vmem:[#allocation2 + $0x228] sm:$0xff]  ;;  %v351_v15 = vmul.f32 %v102_v9, %v102_v9 }
  0x79   :  { %v208_v26 = vadd.f32 %v207_v22, %v88_v17  ;;  %v455_v28 = vadd.f32 %v454_v24, %v336_v19  ;;  %v104_v17 = vld [vmem:[#allocation2 + $0x230] sm:$0xff]  ;;  %v352_v19 = vmul.f32 %v103_v13, %v103_v13 }
  0x7b   :  { %v209_v30 = vadd.f32 %v208_v26, %v89_v21  ;;  %v456_v32 = vadd.f32 %v455_v28, %v337_v23  ;;  %v105_v21 = vld [vmem:[#allocation2 + $0x238] sm:$0xff]  ;;  %v353_v23 = vmul.f32 %v104_v17, %v104_v17 }
  0x7d   :  { %v210_v34 = vadd.f32 %v209_v30, %v90_v25  ;;  %v457_v36 = vadd.f32 %v456_v32, %v338_v27  ;;  %v106_v25 = vld [vmem:[#allocation2 + $0x240] sm:$0xff]  ;;  %v354_v27 = vmul.f32 %v105_v21, %v105_v21 }
  0x7f   :  { %v211_v38 = vadd.f32 %v210_v34, %v91_v29  ;;  %v458_v40 = vadd.f32 %v457_v36, %v339_v31  ;;  %v107_v29 = vld [vmem:[#allocation2 + $0x248] sm:$0xff]  ;;  %v355_v31 = vmul.f32 %v106_v25, %v106_v25 }
  0x81   :  { %v212_v42 = vadd.f32 %v211_v38, %v92_v33  ;;  %v459_v44 = vadd.f32 %v458_v40, %v340_v35  ;;  %v108_v33 = vld [vmem:[#allocation2 + $0x250] sm:$0xff]  ;;  %v356_v35 = vmul.f32 %v107_v29, %v107_v29 }
  0x83   :  { %v213_v46 = vadd.f32 %v212_v42, %v93_v37  ;;  %v460_v48 = vadd.f32 %v459_v44, %v341_v39  ;;  %v109_v37 = vld [vmem:[#allocation2 + $0x258] sm:$0xff]  ;;  %v357_v39 = vmul.f32 %v108_v33, %v108_v33 }
  0x85   :  { %v214_v50 = vadd.f32 %v213_v46, %v94_v41  ;;  %v461_v52 = vadd.f32 %v460_v48, %v342_v43  ;;  %v110_v41 = vld [vmem:[#allocation2 + $0x260] sm:$0xff]  ;;  %v358_v43 = vmul.f32 %v109_v37, %v109_v37 }
  0x87   :  { %v215_v54 = vadd.f32 %v214_v50, %v95_v45  ;;  %v462_v56 = vadd.f32 %v461_v52, %v343_v47  ;;  %v111_v45 = vld [vmem:[#allocation2 + $0x268] sm:$0xff]  ;;  %v359_v47 = vmul.f32 %v110_v41, %v110_v41 }
  0x89   :  { %v216_v58 = vadd.f32 %v215_v54, %v96_v49  ;;  %v463_v60 = vadd.f32 %v462_v56, %v344_v51  ;;  %v112_v49 = vld [vmem:[#allocation2 + $0x270] sm:$0xff]  ;;  %v360_v51 = vmul.f32 %v111_v45, %v111_v45 }
  0x8b   :  { %v217_v62 = vadd.f32 %v216_v58, %v97_v53  ;;  %v464_v0 = vadd.f32 %v463_v60, %v345_v55  ;;  %v113_v53 = vld [vmem:[#allocation2 + $0x278] sm:$0xff]  ;;  %v361_v55 = vmul.f32 %v112_v49, %v112_v49 }
  0x8d   :  { %v218_v2 = vadd.f32 %v217_v62, %v98_v57  ;;  %v465_v4 = vadd.f32 %v464_v0, %v346_v59  ;;  %v114_v57 = vld [vmem:[#allocation2 + $0x280] sm:$0xff]  ;;  %v362_v59 = vmul.f32 %v113_v53, %v113_v53 }
  0x8f   :  { %v219_v6 = vadd.f32 %v218_v2, %v99_v61  ;;  %v466_v8 = vadd.f32 %v465_v4, %v347_v63  ;;  %v115_v61 = vld [vmem:[#allocation2 + $0x288] sm:$0xff]  ;;  %v363_v63 = vmul.f32 %v114_v57, %v114_v57 }
  0x91   :  { %v220_v10 = vadd.f32 %v219_v6, %v100_v1  ;;  %v467_v12 = vadd.f32 %v466_v8, %v348_v3  ;;  %v116_v1 = vld [vmem:[#allocation2 + $0x290] sm:$0xff]  ;;  %v364_v3 = vmul.f32 %v115_v61, %v115_v61 }
  0x93   :  { %v221_v14 = vadd.f32 %v220_v10, %v101_v5  ;;  %v468_v16 = vadd.f32 %v467_v12, %v349_v7  ;;  %v117_v5 = vld [vmem:[#allocation2 + $0x298] sm:$0xff]  ;;  %v365_v7 = vmul.f32 %v116_v1, %v116_v1 }
  0x95   :  { %v222_v18 = vadd.f32 %v221_v14, %v102_v9  ;;  %v469_v20 = vadd.f32 %v468_v16, %v350_v11  ;;  %v118_v9 = vld [vmem:[#allocation2 + $0x2a0] sm:$0xff]  ;;  %v366_v11 = vmul.f32 %v117_v5, %v117_v5 }
  0x97   :  { %v223_v22 = vadd.f32 %v222_v18, %v103_v13  ;;  %v470_v24 = vadd.f32 %v469_v20, %v351_v15  ;;  %v119_v13 = vld [vmem:[#allocation2 + $0x2a8] sm:$0xff]  ;;  %v367_v15 = vmul.f32 %v118_v9, %v118_v9 }
  0x99   :  { %v224_v26 = vadd.f32 %v223_v22, %v104_v17  ;;  %v471_v28 = vadd.f32 %v470_v24, %v352_v19  ;;  %v120_v17 = vld [vmem:[#allocation2 + $0x2b0] sm:$0xff]  ;;  %v368_v19 = vmul.f32 %v119_v13, %v119_v13 }
  0x9b   :  { %v225_v30 = vadd.f32 %v224_v26, %v105_v21  ;;  %v472_v32 = vadd.f32 %v471_v28, %v353_v23  ;;  %v121_v21 = vld [vmem:[#allocation2 + $0x2b8] sm:$0xff]  ;;  %v369_v23 = vmul.f32 %v120_v17, %v120_v17 }
  0x9d   :  { %v226_v34 = vadd.f32 %v225_v30, %v106_v25  ;;  %v473_v36 = vadd.f32 %v472_v32, %v354_v27  ;;  %v122_v25 = vld [vmem:[#allocation2 + $0x2c0] sm:$0xff]  ;;  %v370_v27 = vmul.f32 %v121_v21, %v121_v21 }
  0x9f   :  { %v227_v38 = vadd.f32 %v226_v34, %v107_v29  ;;  %v474_v40 = vadd.f32 %v473_v36, %v355_v31  ;;  %v123_v29 = vld [vmem:[#allocation2 + $0x2c8] sm:$0xff]  ;;  %v371_v31 = vmul.f32 %v122_v25, %v122_v25 }
  0xa1   :  { %v228_v42 = vadd.f32 %v227_v38, %v108_v33  ;;  %v475_v44 = vadd.f32 %v474_v40, %v356_v35  ;;  %v124_v33 = vld [vmem:[#allocation2 + $0x2d0] sm:$0xff]  ;;  %v372_v35 = vmul.f32 %v123_v29, %v123_v29 }
  0xa3   :  { %v229_v46 = vadd.f32 %v228_v42, %v109_v37  ;;  %v476_v48 = vadd.f32 %v475_v44, %v357_v39  ;;  %v125_v37 = vld [vmem:[#allocation2 + $0x2d8] sm:$0xff]  ;;  %v373_v39 = vmul.f32 %v124_v33, %v124_v33 }
  0xa5   :  { %v230_v50 = vadd.f32 %v229_v46, %v110_v41  ;;  %v477_v52 = vadd.f32 %v476_v48, %v358_v43  ;;  %v126_v41 = vld [vmem:[#allocation2 + $0x2e0] sm:$0xff]  ;;  %v374_v43 = vmul.f32 %v125_v37, %v125_v37 }
  0xa7   :  { %v231_v54 = vadd.f32 %v230_v50, %v111_v45  ;;  %v478_v56 = vadd.f32 %v477_v52, %v359_v47  ;;  %v127_v45 = vld [vmem:[#allocation2 + $0x2e8] sm:$0xff]  ;;  %v375_v47 = vmul.f32 %v126_v41, %v126_v41 }
  0xa9   :  { %v232_v58 = vadd.f32 %v231_v54, %v112_v49  ;;  %v479_v60 = vadd.f32 %v478_v56, %v360_v51  ;;  %v128_v49 = vld [vmem:[#allocation2 + $0x2f0] sm:$0xff]  ;;  %v376_v51 = vmul.f32 %v127_v45, %v127_v45 }
  0xab   :  { %v233_v62 = vadd.f32 %v232_v58, %v113_v53  ;;  %v480_v0 = vadd.f32 %v479_v60, %v361_v55  ;;  %v129_v53 = vld [vmem:[#allocation2 + $0x2f8] sm:$0xff]  ;;  %v377_v55 = vmul.f32 %v128_v49, %v128_v49 }
  0xad   :  { %v234_v2 = vadd.f32 %v233_v62, %v114_v57  ;;  %v481_v4 = vadd.f32 %v480_v0, %v362_v59  ;;  %v130_v57 = vld [vmem:[#allocation2 + $0x300] sm:$0xff]  ;;  %v378_v59 = vmul.f32 %v129_v53, %v129_v53 }
  0xaf   :  { %v235_v6 = vadd.f32 %v234_v2, %v115_v61  ;;  %v482_v8 = vadd.f32 %v481_v4, %v363_v63  ;;  %v131_v61 = vld [vmem:[#allocation2 + $0x308] sm:$0xff]  ;;  %v379_v63 = vmul.f32 %v130_v57, %v130_v57 }
  0xb1   :  { %v236_v10 = vadd.f32 %v235_v6, %v116_v1  ;;  %v483_v12 = vadd.f32 %v482_v8, %v364_v3  ;;  %v132_v1 = vld [vmem:[#allocation2 + $0x310] sm:$0xff]  ;;  %v380_v3 = vmul.f32 %v131_v61, %v131_v61 }
  0xb3   :  { %v237_v14 = vadd.f32 %v236_v10, %v117_v5  ;;  %v484_v16 = vadd.f32 %v483_v12, %v365_v7  ;;  %v133_v5 = vld [vmem:[#allocation2 + $0x318] sm:$0xff]  ;;  %v381_v7 = vmul.f32 %v132_v1, %v132_v1 }
  0xb5   :  { %v238_v18 = vadd.f32 %v237_v14, %v118_v9  ;;  %v485_v20 = vadd.f32 %v484_v16, %v366_v11  ;;  %v134_v9 = vld [vmem:[#allocation2 + $0x320] sm:$0xff]  ;;  %v382_v11 = vmul.f32 %v133_v5, %v133_v5 }
  0xb7   :  { %v239_v22 = vadd.f32 %v238_v18, %v119_v13  ;;  %v486_v24 = vadd.f32 %v485_v20, %v367_v15  ;;  %v135_v13 = vld [vmem:[#allocation2 + $0x328] sm:$0xff]  ;;  %v383_v15 = vmul.f32 %v134_v9, %v134_v9 }
  0xb9   :  { %v240_v26 = vadd.f32 %v239_v22, %v120_v17  ;;  %v487_v28 = vadd.f32 %v486_v24, %v368_v19  ;;  %v136_v17 = vld [vmem:[#allocation2 + $0x330] sm:$0xff]  ;;  %v384_v19 = vmul.f32 %v135_v13, %v135_v13 }
  0xbb   :  { %v241_v30 = vadd.f32 %v240_v26, %v121_v21  ;;  %v488_v32 = vadd.f32 %v487_v28, %v369_v23  ;;  %v137_v21 = vld [vmem:[#allocation2 + $0x338] sm:$0xff]  ;;  %v385_v23 = vmul.f32 %v136_v17, %v136_v17 }
  0xbd   :  { %v242_v34 = vadd.f32 %v241_v30, %v122_v25  ;;  %v489_v36 = vadd.f32 %v488_v32, %v370_v27  ;;  %v138_v25 = vld [vmem:[#allocation2 + $0x340] sm:$0xff]  ;;  %v386_v27 = vmul.f32 %v137_v21, %v137_v21 }
  0xbf   :  { %v243_v38 = vadd.f32 %v242_v34, %v123_v29  ;;  %v490_v40 = vadd.f32 %v489_v36, %v371_v31  ;;  %v139_v29 = vld [vmem:[#allocation2 + $0x348] sm:$0xff]  ;;  %v387_v31 = vmul.f32 %v138_v25, %v138_v25 }
  0xc1   :  { %v244_v42 = vadd.f32 %v243_v38, %v124_v33  ;;  %v491_v44 = vadd.f32 %v490_v40, %v372_v35  ;;  %v140_v33 = vld [vmem:[#allocation2 + $0x350] sm:$0xff]  ;;  %v388_v35 = vmul.f32 %v139_v29, %v139_v29 }
  0xc3   :  { %v245_v46 = vadd.f32 %v244_v42, %v125_v37  ;;  %v492_v48 = vadd.f32 %v491_v44, %v373_v39  ;;  %v141_v37 = vld [vmem:[#allocation2 + $0x358] sm:$0xff]  ;;  %v389_v39 = vmul.f32 %v140_v33, %v140_v33 }
  0xc5   :  { %v246_v50 = vadd.f32 %v245_v46, %v126_v41  ;;  %v493_v52 = vadd.f32 %v492_v48, %v374_v43  ;;  %v142_v41 = vld [vmem:[#allocation2 + $0x360] sm:$0xff]  ;;  %v390_v43 = vmul.f32 %v141_v37, %v141_v37 }
  0xc7   :  { %v247_v54 = vadd.f32 %v246_v50, %v127_v45  ;;  %v494_v56 = vadd.f32 %v493_v52, %v375_v47  ;;  %v143_v45 = vld [vmem:[#allocation2 + $0x368] sm:$0xff]  ;;  %v391_v47 = vmul.f32 %v142_v41, %v142_v41 }
  0xc9   :  { %v248_v58 = vadd.f32 %v247_v54, %v128_v49  ;;  %v495_v60 = vadd.f32 %v494_v56, %v376_v51  ;;  %v144_v49 = vld [vmem:[#allocation2 + $0x370] sm:$0xff]  ;;  %v392_v51 = vmul.f32 %v143_v45, %v143_v45 }
  0xcb   :  { %v249_v62 = vadd.f32 %v248_v58, %v129_v53  ;;  %v496_v0 = vadd.f32 %v495_v60, %v377_v55  ;;  %v145_v53 = vld [vmem:[#allocation2 + $0x378] sm:$0xff]  ;;  %v393_v55 = vmul.f32 %v144_v49, %v144_v49 }
  0xcd   :  { %v250_v2 = vadd.f32 %v249_v62, %v130_v57  ;;  %v497_v4 = vadd.f32 %v496_v0, %v378_v59  ;;  %v146_v57 = vld [vmem:[#allocation2 + $0x380] sm:$0xff]  ;;  %v394_v59 = vmul.f32 %v145_v53, %v145_v53 }
  0xcf   :  { %v251_v6 = vadd.f32 %v250_v2, %v131_v61  ;;  %v498_v8 = vadd.f32 %v497_v4, %v379_v63  ;;  %v147_v61 = vld [vmem:[#allocation2 + $0x388] sm:$0xff]  ;;  %v395_v63 = vmul.f32 %v146_v57, %v146_v57 }
  0xd1   :  { %v252_v10 = vadd.f32 %v251_v6, %v132_v1  ;;  %v499_v12 = vadd.f32 %v498_v8, %v380_v3  ;;  %v148_v1 = vld [vmem:[#allocation2 + $0x390] sm:$0xff]  ;;  %v396_v3 = vmul.f32 %v147_v61, %v147_v61 }
  0xd3   :  { %v253_v14 = vadd.f32 %v252_v10, %v133_v5  ;;  %v500_v16 = vadd.f32 %v499_v12, %v381_v7  ;;  %v149_v5 = vld [vmem:[#allocation2 + $0x398] sm:$0xff]  ;;  %v397_v7 = vmul.f32 %v148_v1, %v148_v1 }
  0xd5   :  { %v254_v18 = vadd.f32 %v253_v14, %v134_v9  ;;  %v501_v20 = vadd.f32 %v500_v16, %v382_v11  ;;  %v150_v9 = vld [vmem:[#allocation2 + $0x3a0] sm:$0xff]  ;;  %v398_v11 = vmul.f32 %v149_v5, %v149_v5 }
  0xd7   :  { %v255_v22 = vadd.f32 %v254_v18, %v135_v13  ;;  %v502_v24 = vadd.f32 %v501_v20, %v383_v15  ;;  %v151_v13 = vld [vmem:[#allocation2 + $0x3a8] sm:$0xff]  ;;  %v399_v15 = vmul.f32 %v150_v9, %v150_v9 }
  0xd9   :  { %v256_v26 = vadd.f32 %v255_v22, %v136_v17  ;;  %v503_v28 = vadd.f32 %v502_v24, %v384_v19  ;;  %v152_v17 = vld [vmem:[#allocation2 + $0x3b0] sm:$0xff]  ;;  %v400_v19 = vmul.f32 %v151_v13, %v151_v13 }
  0xdb   :  { %v257_v30 = vadd.f32 %v256_v26, %v137_v21  ;;  %v504_v32 = vadd.f32 %v503_v28, %v385_v23  ;;  %v153_v21 = vld [vmem:[#allocation2 + $0x3b8] sm:$0xff]  ;;  %v401_v23 = vmul.f32 %v152_v17, %v152_v17 }
  0xdc   :  { %v402_v26 = vmul.f32 %v153_v21, %v153_v21 }
  0xdd   :  { %v258_v34 = vadd.f32 %v257_v30, %v138_v25  ;;  %v505_v36 = vadd.f32 %v504_v32, %v386_v27 }
  0xdf   :  { %v259_v38 = vadd.f32 %v258_v34, %v139_v29  ;;  %v506_v40 = vadd.f32 %v505_v36, %v387_v31 }
  0xe1   :  { %v260_v42 = vadd.f32 %v259_v38, %v140_v33  ;;  %v507_v44 = vadd.f32 %v506_v40, %v388_v35 }
  0xe3   :  { %v261_v46 = vadd.f32 %v260_v42, %v141_v37  ;;  %v508_v48 = vadd.f32 %v507_v44, %v389_v39  ;;  %v154_v39 = vld [vmem:[#allocation5] sm:$0x1] }
  0xe5   :  { %v262_v50 = vadd.f32 %v261_v46, %v142_v41  ;;  %v509_v52 = vadd.f32 %v508_v48, %v390_v43 }
  0xe7   :  { %v263_v54 = vadd.f32 %v262_v50, %v143_v45  ;;  %v510_v56 = vadd.f32 %v509_v52, %v391_v47  ;;  %v282_v45 = vld [vmem:[#allocation5 + $0x1] sm:$0x1] }
  0xe9   :  { %v264_v58 = vadd.f32 %v263_v54, %v144_v49  ;;  %v511_v60 = vadd.f32 %v510_v56, %v392_v51  ;;  %v539_v54 = vld [vmem:[%s652_s1] sm:$0x1] }
  0xeb   :  { %v265_v62 = vadd.f32 %v264_v58, %v145_v53  ;;  %v512_v0 = vadd.f32 %v511_v60, %v393_v55 }
  0xed   :  { %v266_v2 = vadd.f32 %v265_v62, %v146_v57  ;;  %v513_v4 = vadd.f32 %v512_v0, %v394_v59  ;;  %v544_v57 = vld [vmem:[%s653_s2] sm:$0x1] }
  0xef   :  { %v267_v6 = vadd.f32 %v266_v2, %v147_v61  ;;  %v514_v8 = vadd.f32 %v513_v4, %v395_v63 }
  0xf1   :  { %v268_v10 = vadd.f32 %v267_v6, %v148_v1  ;;  %v515_v12 = vadd.f32 %v514_v8, %v396_v3 }
  0xf3   :  { %v269_v14 = vadd.f32 %v268_v10, %v149_v5  ;;  %v516_v16 = vadd.f32 %v515_v12, %v397_v7 }
  0xf5   :  { %v270_v18 = vadd.f32 %v269_v14, %v150_v9  ;;  %v517_v20 = vadd.f32 %v516_v16, %v398_v11 }
  0xf7   :  { %v271_v22 = vadd.f32 %v270_v18, %v151_v13  ;;  %v518_v24 = vadd.f32 %v517_v20, %v399_v15 }
  0xf9   :  { %v272_v25 = vadd.f32 %v271_v22, %v152_v17  ;;  %v519_v27 = vadd.f32 %v518_v24, %v400_v19 }
  0xfb   :  { %v273_v28 = vadd.f32 %v272_v25, %v153_v21  ;;  %v520_v29 = vadd.f32 %v519_v27, %v401_v23 }
  0xfd   :  { %v274_v30 = vrot.slane %v273_v28, 4  ;;  %v521_v31 = vadd.f32 %v520_v29, %v402_v26 }
  0xff   :  { %v275_v32 = vadd.f32 %v274_v30, %v273_v28  ;;  %v522_v33 = vrot.slane %v521_v31, 4 }
 0x101   :  { %v276_v34 = vrot.slane %v275_v32, 2  ;;  %v523_v35 = vadd.f32 %v522_v33, %v521_v31 }
 0x103   :  { %v277_v36 = vadd.f32 %v276_v34, %v275_v32  ;;  %v524_v37 = vrot.slane %v523_v35, 2 }
 0x105   :  { %v278_v38 = vrot.slane %v277_v36, 1  ;;  %v525_v40 = vadd.f32 %v524_v37, %v523_v35 }
 0x107   :  { %v279_v41 = vadd.f32 %v278_v38, %v277_v36  ;;  %v526_v42 = vrot.slane %v525_v40, 1 }
 0x109   :  { %v280_v43 = vadd.f32 %v279_v41, %v154_v39  ;;  %v527_v44 = vadd.f32 %v526_v42, %v525_v40 }
 0x10b   :  { %281 = vst [vmem:[#allocation5] sm:$0x1] %v280_v43  ;;  %v528_v46 = vadd.f32 %v527_v44, %v282_v45 }
 0x10d   :  { %529 = vst [vmem:[#allocation5 + $0x1] sm:$0x1] %v528_v46 }
 0x112   :  { %v533_v47 = vld [vmem:[#allocation5] sm:$0x1] }
 0x113   :  { %v534_v48 = vmul.f32 0.001953125, %v533_v47 }
 0x114   :  { %v535_v49 = vld [vmem:[#allocation5 + $0x1] sm:$0x1] }
 0x115   :  { %v537_v50 = vmul.f32 %v534_v48, %v534_v48  ;;  %v536_v51 = vmul.f32 0.001953125, %v535_v49 }
 0x117   :  { %v538_v52 = vsub.f32 %v536_v51, %v537_v50 }
 0x119   :  { %v540_v53 = vadd.f32 1e-05, %v538_v52 }
 0x11b   :  { %568 = vrsqrt.f32 %v540_v53 }
 0x128   :  { %v569_v55 = vpop.eup %568 }
 0x129   :  { %v542_v56 = vmul.f32 %v569_v55, %v539_v54 }
 0x12b   :  { %543 = vst [vmem:[#allocation5] sm:$0x1] %v542_v56  ;;  %v545_v58 = vmul.f32 %v542_v56, %v534_v48 }
 0x12d   :  { %v546_v59 = vsub.f32 %v544_v57, %v545_v58 }
 0x12f   :  { %547 = vst [vmem:[#allocation5 + $0x1] sm:$0x1] %v546_v59 }
 0x130   :  { %601 = shalt.err (!%p598_p9)
}
 0x131   :  { %557 = dma.vmem_to_hbm [thread:$0]  %s555_s23, 32, %s654_s3, [#allocation4]  }
 0x132   :  { %612 = dma.done.wait [#allocation4], 32  }
 0x133   :  { %613 = vsyncadd [#allocation4], 4294967264 }
 0x134   :  { %561 = vsyncpa [#allocation3], 1 }
 0x135   :  { %562 = vsyncpa [#allocation4], 1 }

</bundles_post_ra>
